<compile_context>
chip_gen: v7x
topology: tpu7x:2x2x1
jax: 0.10.0
libtpu: 0.0.40
codegen_flags: <defaults>
</compile_context>

<pallas_src>
import numpy as np
import jax
import jax.numpy as jnp
from jax import lax
from jax.experimental import pallas as pl
from jax.experimental.pallas import tpu as pltpu


def energy_force_loss_kernel(
    emb_ref,      # (N, Hp)     f32  node embeddings from rep model (lane-dense padded)
    nodes_ref,    # (N, 8)      f32  [pos(3) | force_tgt(3) | node2graph | pad]
    w123_ref,     # (3, Hp, Hp) f32  [w1, w2, w3] zero-padded
    small_ref,    # (8+G, Hp)   f32  [wp(3), b1, b2, b3, w4, b4-row, energy_tgt rows]
    loss_ref,     # (2,)        f32  SMEM out: [e_loss, f_loss]
):
    f32 = jnp.float32

    emb = emb_ref[...]                       # (N, Hp)
    nodes = nodes_ref[...]                   # (N, 8)
    pos = nodes[:, 0:3]                      # (N, 3)
    ftgt = nodes[:, 3:6]                     # (N, 3)
    n2g = nodes[:, 6:7]                      # (N, 1) graph id as f32 (exact small ints)

    w1 = w123_ref[0]                         # (Hp, Hp)
    w2 = w123_ref[1]
    w3 = w123_ref[2]

    small = small_ref[...]                   # (8+G, Hp)
    wp = small[0:3, :]                       # (3, Hp) position lift
    b1 = small[3:4, :]
    b2 = small[4:5, :]
    b3 = small[5:6, :]
    w4 = small[6:7, :]                       # (1, Hp) graph_dec final weight (row layout)
    b4 = small[7:8, 0:1]                     # (1, 1)

    N = emb.shape[0]
    G = small.shape[0] - 8
    etgt = small[8:8 + G, 0:1]               # (G, 1) energy targets

    # ---------------- forward ----------------
    # rep model lift: x0 = emb + pos @ wp, done as 3 VPU broadcast-FMAs (K=3 too small
    # for a useful MXU pass).
    x0 = emb
    for k in range(3):
        x0 = x0 + pos[:, k:k + 1] * wp[k:k + 1, :]                       # (N, Hp)

    # node_dec: Linear -> SiLU -> Linear
    u1 = jnp.dot(x0, w1, preferred_element_type=f32) + b1                # (N, Hp)
    s1 = jax.nn.sigmoid(u1)
    h1 = u1 * s1                                                         # silu
    xl = jnp.dot(h1, w2, preferred_element_type=f32) + b2                # (N, Hp)

    # scatter_add(node -> graph): G masked sublane reductions (XLU), no one-hot, no MXU.
    xg_rows = []
    for g in range(G):
        m = (n2g == jnp.float32(g))                                      # (N, 1)
        xg_rows.append(jnp.sum(jnp.where(m, xl, 0.0), axis=0, keepdims=True))
    xg = jnp.concatenate(xg_rows, axis=0)                                # (G, Hp)

    # graph_dec: Linear -> SiLU -> Linear(->1).  Final out_features=1 stays on VPU/XLU.
    u3 = jnp.dot(xg, w3, preferred_element_type=f32) + b3                # (G, Hp)
    s3 = jax.nn.sigmoid(u3)
    g1 = u3 * s3
    e = jnp.sum(g1 * w4, axis=-1, keepdims=True) + b4                    # (G, 1)

    # ---------------- backward: force = -d(sum e)/d pos ----------------
    dsilu3 = s3 * (1.0 + u3 * (1.0 - s3))                                # silu'(u3)
    du3 = w4 * dsilu3                                                    # (G, Hp)
    dxg = lax.dot_general(du3, w3, (((1,), (1,)), ((), ())),
                          preferred_element_type=f32)                    # (G, Hp) = du3 @ w3^T

    # per-node row gather of dxg driven by n2g: VPU select chain (no K=G MXU pass).
    dxl = jnp.zeros_like(xl)                                             # (N, Hp)
    for g in range(G):
        dxl = jnp.where(n2g == jnp.float32(g), dxg[g:g + 1, :], dxl)

    dh1 = lax.dot_general(dxl, w2, (((1,), (1,)), ((), ())),
                          preferred_element_type=f32)                    # (N, Hp) = dxl @ w2^T
    dsilu1 = s1 * (1.0 + u1 * (1.0 - s1))
    du1 = dh1 * dsilu1                                                   # (N, Hp)
    dx0 = lax.dot_general(du1, w1, (((1,), (1,)), ((), ())),
                          preferred_element_type=f32)                    # (N, Hp) = du1 @ w1^T

    # dpos[:, k] = sum_h dx0[:, h] * wp[k, h]; fold straight into the L1 force loss so
    # the lane-sparse (N, 3) force tensor is never stored.
    f_abs = jnp.float32(0.0)
    for k in range(3):
        dpos_k = jnp.sum(dx0 * wp[k:k + 1, :], axis=-1, keepdims=True)   # (N, 1)
        f_abs = f_abs + jnp.sum(jnp.abs(-dpos_k - ftgt[:, k:k + 1]))
    f_loss = f_abs / jnp.float32(N * 3)

    e_loss = jnp.sum(jnp.abs(e - etgt)) / jnp.float32(G)

    loss_ref[0] = e_loss
    loss_ref[1] = f_loss


def equivariant_denoise_pred_losses(emb, pos, node2graph, params, energy_tgt, force_tgt):
    """Packs / lane-pads parameters (glue) and calls the fused Pallas kernel."""
    wp, w1, b1, w2, b2, w3, b3, w4_row, b4 = params
    N, H = emb.shape
    G = energy_tgt.shape[0]
    Hp = ((H + 127) // 128) * 128            # lane-dense hidden dim

    def padh(x):                             # zero-pad last dim H -> Hp
        return jnp.pad(x, [(0, 0)] * (x.ndim - 1) + [(0, Hp - H)])

    # --- operand packing / padding: 4 VMEM inputs total ---
    emb_p = padh(emb)                                                    # (N, Hp)
    w123 = jnp.stack([
        jnp.pad(w1, ((0, Hp - H), (0, Hp - H))),
        jnp.pad(w2, ((0, Hp - H), (0, Hp - H))),
        jnp.pad(w3, ((0, Hp - H), (0, Hp - H))),
    ], axis=0)                                                           # (3, Hp, Hp)
    b4_row = jnp.zeros((1, Hp), jnp.float32).at[0, 0].set(b4[0])
    etgt_rows = jnp.zeros((G, Hp), jnp.float32).at[:, 0].set(energy_tgt[:, 0])
    small = jnp.concatenate(
        [padh(wp), padh(b1[None, :]), padh(b2[None, :]), padh(b3[None, :]),
         padh(w4_row), b4_row, etgt_rows], axis=0)                       # (8+G, Hp)
    nodes = jnp.concatenate(
        [pos, force_tgt, node2graph.astype(jnp.float32)[:, None],
         jnp.zeros((N, 1), jnp.float32)], axis=1)                        # (N, 8)

    # --- advisory cost estimate for XLA's scheduler ---
    flops = (4 * 2 * N * Hp * Hp        # node-level Hp x Hp matmuls (fwd + bwd)
             + 2 * 2 * G * Hp * Hp      # graph-level Hp x Hp matmuls (fwd + bwd)
             + 4 * N * G * Hp           # masked segment sums / selects
             + 12 * N * Hp + 8 * G * Hp + 2 * 3 * N * Hp)
    transcendentals = (N + G) * Hp
    bytes_accessed = 4 * (emb_p.size + nodes.size + w123.size + small.size + 2)

    vmem = pl.BlockSpec(memory_space=pltpu.MemorySpace.VMEM)
    losses = pl.pallas_call(
        energy_force_loss_kernel,
        out_shape=jax.ShapeDtypeStruct((2,), jnp.float32),
        in_specs=[vmem, vmem, vmem, vmem],
        out_specs=pl.BlockSpec(memory_space=pltpu.MemorySpace.SMEM),
        cost_estimate=pl.CostEstimate(
            flops=flops, transcendentals=transcendentals, bytes_accessed=bytes_accessed),
    )(emb_p, nodes, w123, small)
    return losses[0], losses[1]


# ------------------------- pure-JAX reference (autograd) -------------------------
def reference_losses(emb, pos, node2graph, params, energy_tgt, force_tgt):
    wp, w1, b1, w2, b2, w3, b3, w4_row, b4 = params
    G = energy_tgt.shape[0]
    seg = jax.nn.one_hot(node2graph, G, dtype=jnp.float32)

    def energy_fn(p):
        x0 = emb + p @ wp
        h1 = jax.nn.silu(x0 @ w1 + b1)
        xl = h1 @ w2 + b2
        xg = seg.T @ xl
        g1 = jax.nn.silu(xg @ w3 + b3)
        e = g1 @ w4_row.T + b4
        return e.sum(), e

    (_, e), dpos = jax.value_and_grad(energy_fn, has_aux=True)(pos)
    force = -dpos
    e_loss = jnp.mean(jnp.abs(e - energy_tgt))
    f_loss = jnp.mean(jnp.abs(force - force_tgt))
    return e_loss, f_loss


if __name__ == "__main__":
    key = jax.random.PRNGKey(0)
    ks = jax.random.split(key, 16)

    N = 16            # number of atoms / nodes
    G = 2             # number of graphs in the batch
    H = 32            # hidden_dim
    NUM_ATOM_TYPES = 5
    NUM_NOISE_LEVEL = 10

    # --- data (deterministic) ---
    z = jax.random.randint(ks[0], (N,), 0, NUM_ATOM_TYPES)                  # atom types
    pos = jax.random.normal(ks[1], (N, 3), jnp.float32)                     # data.pos
    node2graph = jnp.concatenate([jnp.zeros(N // 2, jnp.int32),
                                  jnp.ones(N - N // 2, jnp.int32)])         # data.batch
    energy_tgt = jax.random.normal(ks[2], (G, 1), jnp.float32)              # data.energy.unsqueeze(1)
    force_tgt = jax.random.normal(ks[3], (N, 3), jnp.float32)               # data.force

    # --- parameters (deterministic init; shapes follow __init__) ---
    scale = 0.1
    emb_table = scale * jax.random.normal(ks[4], (NUM_ATOM_TYPES, H), jnp.float32)
    wp = scale * jax.random.normal(ks[5], (3, H), jnp.float32)              # rep-model pos lift
    w1 = scale * jax.random.normal(ks[6], (H, H), jnp.float32)              # node_dec[0]
    b1 = scale * jax.random.normal(ks[7], (H,), jnp.float32)
    w2 = scale * jax.random.normal(ks[8], (H, H), jnp.float32)              # node_dec[2]
    b2 = scale * jax.random.normal(ks[9], (H,), jnp.float32)
    w3 = scale * jax.random.normal(ks[10], (H, H), jnp.float32)             # graph_dec[0]
    b3 = scale * jax.random.normal(ks[11], (H,), jnp.float32)
    w4 = scale * jax.random.normal(ks[12], (1, H), jnp.float32)             # graph_dec[2] (out,in)
    b4 = scale * jax.random.normal(ks[13], (1,), jnp.float32)
    params = (wp, w1, b1, w2, b2, w3, b3, w4, b4)

    # sigmas / used_sigmas: mirrored from the torch forward but (as in torch) they do not
    # influence e_loss / f_loss.
    sigmas = jnp.exp(jnp.linspace(jnp.log(10.0), jnp.log(0.01), NUM_NOISE_LEVEL)).astype(jnp.float32)
    noise_level = jax.random.randint(ks[14], (G,), 0, NUM_NOISE_LEVEL)
    used_sigmas = sigmas[noise_level][node2graph][:, None]                  # unused downstream
    # TODO(synk): perturb()/mask()/fit_pos()/noise_pred/decoder/SchNetDecoder are defined in
    # __init__ but never exercised by forward(); they are intentionally not translated.

    emb = emb_table[z]                                                      # embedding lookup (glue)

    e_loss, f_loss = jax.jit(equivariant_denoise_pred_losses)(
        emb, pos, node2graph, params, energy_tgt, force_tgt)
    jax.block_until_ready((e_loss, f_loss))

    e_ref, f_ref = reference_losses(emb, pos, node2graph, params, energy_tgt, force_tgt)
    np.testing.assert_allclose(np.asarray(e_loss), np.asarray(e_ref), rtol=2e-3, atol=2e-3)
    np.testing.assert_allclose(np.asarray(f_loss), np.asarray(f_ref), rtol=2e-3, atol=2e-3)

    print("KERNEL_OK")
</pallas_src>

<mosaic_0001>
module attributes {stable_mosaic.version = 11 : i64} {
  func.func @energy_force_loss_kernel(%arg0: memref<16x128xf32, #tpu.memory_space<vmem>>, %arg1: memref<16x8xf32, #tpu.memory_space<vmem>>, %arg2: memref<3x128x128xf32, #tpu.memory_space<vmem>>, %arg3: memref<10x128xf32, #tpu.memory_space<vmem>>, %arg4: memref<2xf32, #tpu.memory_space<smem>>) attributes {dimension_semantics = [], scalar_prefetch = 0 : i64, scratch_operands = 0 : i64, tpu.core_type = #tpu.core_type<tc>} {
    %c0 = arith.constant 0 : index
    %c0_0 = arith.constant 0 : index
    %0 = vector.load %arg0[%c0, %c0_0] : memref<16x128xf32, #tpu.memory_space<vmem>>, vector<16x128xf32>
    %c0_1 = arith.constant 0 : index
    %c0_2 = arith.constant 0 : index
    %1 = vector.load %arg1[%c0_1, %c0_2] : memref<16x8xf32, #tpu.memory_space<vmem>>, vector<16x8xf32>
    %2 = vector.extract_strided_slice %1 {offsets = [0, 0], sizes = [16, 3], strides = [1, 1]} : vector<16x8xf32> to vector<16x3xf32>
    %3 = vector.extract_strided_slice %1 {offsets = [0, 3], sizes = [16, 3], strides = [1, 1]} : vector<16x8xf32> to vector<16x3xf32>
    %4 = vector.extract_strided_slice %1 {offsets = [0, 6], sizes = [16, 1], strides = [1, 1]} : vector<16x8xf32> to vector<16x1xf32>
    %c0_3 = arith.constant 0 : index
    %c0_4 = arith.constant 0 : index
    %c0_5 = arith.constant 0 : index
    %5 = vector.load %arg2[%c0_3, %c0_4, %c0_5] : memref<3x128x128xf32, #tpu.memory_space<vmem>>, vector<1x128x128xf32>
    %6 = vector.shape_cast %5 : vector<1x128x128xf32> to vector<128x128xf32>
    %c1 = arith.constant 1 : index
    %c0_6 = arith.constant 0 : index
    %c0_7 = arith.constant 0 : index
    %7 = vector.load %arg2[%c1, %c0_6, %c0_7] : memref<3x128x128xf32, #tpu.memory_space<vmem>>, vector<1x128x128xf32>
    %8 = vector.shape_cast %7 : vector<1x128x128xf32> to vector<128x128xf32>
    %c2 = arith.constant 2 : index
    %c0_8 = arith.constant 0 : index
    %c0_9 = arith.constant 0 : index
    %9 = vector.load %arg2[%c2, %c0_8, %c0_9] : memref<3x128x128xf32, #tpu.memory_space<vmem>>, vector<1x128x128xf32>
    %10 = vector.shape_cast %9 : vector<1x128x128xf32> to vector<128x128xf32>
    %c0_10 = arith.constant 0 : index
    %c0_11 = arith.constant 0 : index
    %11 = vector.load %arg3[%c0_10, %c0_11] : memref<10x128xf32, #tpu.memory_space<vmem>>, vector<10x128xf32>
    %12 = vector.extract_strided_slice %11 {offsets = [0, 0], sizes = [3, 128], strides = [1, 1]} : vector<10x128xf32> to vector<3x128xf32>
    %13 = vector.extract_strided_slice %11 {offsets = [3, 0], sizes = [1, 128], strides = [1, 1]} : vector<10x128xf32> to vector<1x128xf32>
    %14 = vector.extract_strided_slice %11 {offsets = [4, 0], sizes = [1, 128], strides = [1, 1]} : vector<10x128xf32> to vector<1x128xf32>
    %15 = vector.extract_strided_slice %11 {offsets = [5, 0], sizes = [1, 128], strides = [1, 1]} : vector<10x128xf32> to vector<1x128xf32>
    %16 = vector.extract_strided_slice %11 {offsets = [6, 0], sizes = [1, 128], strides = [1, 1]} : vector<10x128xf32> to vector<1x128xf32>
    %17 = vector.extract_strided_slice %11 {offsets = [7, 0], sizes = [1, 1], strides = [1, 1]} : vector<10x128xf32> to vector<1x1xf32>
    %18 = vector.extract_strided_slice %11 {offsets = [8, 0], sizes = [2, 1], strides = [1, 1]} : vector<10x128xf32> to vector<2x1xf32>
    %19 = vector.extract_strided_slice %2 {offsets = [0, 0], sizes = [16, 1], strides = [1, 1]} : vector<16x3xf32> to vector<16x1xf32>
    %20 = vector.extract_strided_slice %12 {offsets = [0, 0], sizes = [1, 128], strides = [1, 1]} : vector<3x128xf32> to vector<1x128xf32>
    %21 = vector.broadcast %19 : vector<16x1xf32> to vector<16x128xf32>
    %22 = vector.broadcast %20 : vector<1x128xf32> to vector<16x128xf32>
    %23 = arith.mulf %21, %22 : vector<16x128xf32>
    %24 = arith.addf %0, %23 : vector<16x128xf32>
    %25 = vector.extract_strided_slice %2 {offsets = [0, 1], sizes = [16, 1], strides = [1, 1]} : vector<16x3xf32> to vector<16x1xf32>
    %26 = vector.extract_strided_slice %12 {offsets = [1, 0], sizes = [1, 128], strides = [1, 1]} : vector<3x128xf32> to vector<1x128xf32>
    %27 = vector.broadcast %25 : vector<16x1xf32> to vector<16x128xf32>
    %28 = vector.broadcast %26 : vector<1x128xf32> to vector<16x128xf32>
    %29 = arith.mulf %27, %28 : vector<16x128xf32>
    %30 = arith.addf %24, %29 : vector<16x128xf32>
    %31 = vector.extract_strided_slice %2 {offsets = [0, 2], sizes = [16, 1], strides = [1, 1]} : vector<16x3xf32> to vector<16x1xf32>
    %32 = vector.extract_strided_slice %12 {offsets = [2, 0], sizes = [1, 128], strides = [1, 1]} : vector<3x128xf32> to vector<1x128xf32>
    %33 = vector.broadcast %31 : vector<16x1xf32> to vector<16x128xf32>
    %34 = vector.broadcast %32 : vector<1x128xf32> to vector<16x128xf32>
    %35 = arith.mulf %33, %34 : vector<16x128xf32>
    %36 = arith.addf %30, %35 : vector<16x128xf32>
    %cst = arith.constant dense<0.000000e+00> : vector<16x128xf32>
    %37 = tpu.matmul %36, %6, %cst {dimension_numbers = #tpu.dot_dimension_numbers<[1], [0], [0], [1], [0, 0, 1, 1], [], []>} : vector<16x128xf32>, vector<128x128xf32>, vector<16x128xf32> -> vector<16x128xf32>
    %38 = vector.broadcast %13 : vector<1x128xf32> to vector<16x128xf32>
    %39 = arith.addf %37, %38 : vector<16x128xf32>
    %40 = arith.negf %39 : vector<16x128xf32>
    %41 = math.exp %40 : vector<16x128xf32>
    %cst_12 = arith.constant 1.000000e+00 : f32
    %42 = vector.broadcast %cst_12 : f32 to vector<16x128xf32>
    %43 = arith.addf %42, %41 : vector<16x128xf32>
    %44 = arith.divf %42, %43 : vector<16x128xf32>
    %45 = arith.mulf %39, %44 : vector<16x128xf32>
    %cst_13 = arith.constant dense<0.000000e+00> : vector<16x128xf32>
    %46 = tpu.matmul %45, %8, %cst_13 {dimension_numbers = #tpu.dot_dimension_numbers<[1], [0], [0], [1], [0, 0, 1, 1], [], []>} : vector<16x128xf32>, vector<128x128xf32>, vector<16x128xf32> -> vector<16x128xf32>
    %47 = vector.broadcast %14 : vector<1x128xf32> to vector<16x128xf32>
    %48 = arith.addf %46, %47 : vector<16x128xf32>
    %cst_14 = arith.constant 0.000000e+00 : f32
    %49 = vector.broadcast %cst_14 : f32 to vector<16x1xf32>
    %50 = arith.cmpf oeq, %4, %49 : vector<16x1xf32>
    %cst_15 = arith.constant 0.000000e+00 : f32
    %51 = vector.shape_cast %50 : vector<16x1xi1> to vector<16x1xi1>
    %52 = vector.broadcast %51 : vector<16x1xi1> to vector<16x128xi1>
    %53 = vector.broadcast %cst_15 : f32 to vector<16x128xf32>
    %54 = arith.select %52, %48, %53 : vector<16x128xi1>, vector<16x128xf32>
    %cst_16 = arith.constant dense<0.000000e+00> : vector<128xf32>
    %55 = vector.multi_reduction <add>, %54, %cst_16 [0] : vector<16x128xf32> to vector<128xf32>
    %56 = vector.shape_cast %55 : vector<128xf32> to vector<1x128xf32>
    %cst_17 = arith.constant 1.000000e+00 : f32
    %57 = vector.broadcast %cst_17 : f32 to vector<16x1xf32>
    %58 = arith.cmpf oeq, %4, %57 : vector<16x1xf32>
    %cst_18 = arith.constant 0.000000e+00 : f32
    %59 = vector.shape_cast %58 : vector<16x1xi1> to vector<16x1xi1>
    %60 = vector.broadcast %59 : vector<16x1xi1> to vector<16x128xi1>
    %61 = vector.broadcast %cst_18 : f32 to vector<16x128xf32>
    %62 = arith.select %60, %48, %61 : vector<16x128xi1>, vector<16x128xf32>
    %cst_19 = arith.constant dense<0.000000e+00> : vector<128xf32>
    %63 = vector.multi_reduction <add>, %62, %cst_19 [0] : vector<16x128xf32> to vector<128xf32>
    %64 = vector.shape_cast %63 : vector<128xf32> to vector<1x128xf32>
    %65 = tpu.concatenate %56, %64 in 0 : vector<1x128xf32>, vector<1x128xf32> -> vector<2x128xf32>
    %cst_20 = arith.constant dense<0.000000e+00> : vector<2x128xf32>
    %66 = tpu.matmul %65, %10, %cst_20 {dimension_numbers = #tpu.dot_dimension_numbers<[1], [0], [0], [1], [0, 0, 1, 1], [], []>} : vector<2x128xf32>, vector<128x128xf32>, vector<2x128xf32> -> vector<2x128xf32>
    %67 = vector.broadcast %15 : vector<1x128xf32> to vector<2x128xf32>
    %68 = arith.addf %66, %67 : vector<2x128xf32>
    %69 = arith.negf %68 : vector<2x128xf32>
    %70 = math.exp %69 : vector<2x128xf32>
    %cst_21 = arith.constant 1.000000e+00 : f32
    %71 = vector.broadcast %cst_21 : f32 to vector<2x128xf32>
    %72 = arith.addf %71, %70 : vector<2x128xf32>
    %73 = arith.divf %71, %72 : vector<2x128xf32>
    %74 = arith.mulf %68, %73 : vector<2x128xf32>
    %75 = vector.broadcast %16 : vector<1x128xf32> to vector<2x128xf32>
    %76 = arith.mulf %74, %75 : vector<2x128xf32>
    %cst_22 = arith.constant dense<0.000000e+00> : vector<2xf32>
    %77 = vector.multi_reduction <add>, %76, %cst_22 [1] : vector<2x128xf32> to vector<2xf32>
    %78 = vector.shape_cast %77 : vector<2xf32> to vector<2x1xf32>
    %79 = vector.broadcast %17 : vector<1x1xf32> to vector<2x1xf32>
    %80 = arith.addf %78, %79 : vector<2x1xf32>
    %cst_23 = arith.constant 1.000000e+00 : f32
    %81 = vector.broadcast %cst_23 : f32 to vector<2x128xf32>
    %82 = arith.subf %81, %73 : vector<2x128xf32>
    %83 = arith.mulf %68, %82 : vector<2x128xf32>
    %cst_24 = arith.constant 1.000000e+00 : f32
    %84 = vector.broadcast %cst_24 : f32 to vector<2x128xf32>
    %85 = arith.addf %84, %83 : vector<2x128xf32>
    %86 = arith.mulf %73, %85 : vector<2x128xf32>
    %87 = vector.broadcast %16 : vector<1x128xf32> to vector<2x128xf32>
    %88 = arith.mulf %87, %86 : vector<2x128xf32>
    %cst_25 = arith.constant dense<0.000000e+00> : vector<2x128xf32>
    %89 = tpu.matmul %88, %10, %cst_25 {dimension_numbers = #tpu.dot_dimension_numbers<[1], [1], [0], [0], [0, 0, 1, 0], [], []>} : vector<2x128xf32>, vector<128x128xf32>, vector<2x128xf32> -> vector<2x128xf32>
    %cst_26 = arith.constant 0.000000e+00 : f32
    %90 = vector.broadcast %cst_26 : f32 to vector<16x128xf32>
    %cst_27 = arith.constant 0.000000e+00 : f32
    %91 = vector.broadcast %cst_27 : f32 to vector<16x1xf32>
    %92 = arith.cmpf oeq, %4, %91 : vector<16x1xf32>
    %93 = vector.extract_strided_slice %89 {offsets = [0, 0], sizes = [1, 128], strides = [1, 1]} : vector<2x128xf32> to vector<1x128xf32>
    %94 = vector.shape_cast %92 : vector<16x1xi1> to vector<16x1xi1>
    %95 = vector.broadcast %94 : vector<16x1xi1> to vector<16x128xi1>
    %96 = vector.shape_cast %93 : vector<1x128xf32> to vector<1x128xf32>
    %97 = vector.broadcast %96 : vector<1x128xf32> to vector<16x128xf32>
    %98 = arith.select %95, %97, %90 : vector<16x128xi1>, vector<16x128xf32>
    %cst_28 = arith.constant 1.000000e+00 : f32
    %99 = vector.broadcast %cst_28 : f32 to vector<16x1xf32>
    %100 = arith.cmpf oeq, %4, %99 : vector<16x1xf32>
    %101 = vector.extract_strided_slice %89 {offsets = [1, 0], sizes = [1, 128], strides = [1, 1]} : vector<2x128xf32> to vector<1x128xf32>
    %102 = vector.shape_cast %100 : vector<16x1xi1> to vector<16x1xi1>
    %103 = vector.broadcast %102 : vector<16x1xi1> to vector<16x128xi1>
    %104 = vector.shape_cast %101 : vector<1x128xf32> to vector<1x128xf32>
    %105 = vector.broadcast %104 : vector<1x128xf32> to vector<16x128xf32>
    %106 = arith.select %103, %105, %98 : vector<16x128xi1>, vector<16x128xf32>
    %cst_29 = arith.constant dense<0.000000e+00> : vector<16x128xf32>
    %107 = tpu.matmul %106, %8, %cst_29 {dimension_numbers = #tpu.dot_dimension_numbers<[1], [1], [0], [0], [0, 0, 1, 0], [], []>} : vector<16x128xf32>, vector<128x128xf32>, vector<16x128xf32> -> vector<16x128xf32>
    %cst_30 = arith.constant 1.000000e+00 : f32
    %108 = vector.broadcast %cst_30 : f32 to vector<16x128xf32>
    %109 = arith.subf %108, %44 : vector<16x128xf32>
    %110 = arith.mulf %39, %109 : vector<16x128xf32>
    %cst_31 = arith.constant 1.000000e+00 : f32
    %111 = vector.broadcast %cst_31 : f32 to vector<16x128xf32>
    %112 = arith.addf %111, %110 : vector<16x128xf32>
    %113 = arith.mulf %44, %112 : vector<16x128xf32>
    %114 = arith.mulf %107, %113 : vector<16x128xf32>
    %cst_32 = arith.constant dense<0.000000e+00> : vector<16x128xf32>
    %115 = tpu.matmul %114, %6, %cst_32 {dimension_numbers = #tpu.dot_dimension_numbers<[1], [1], [0], [0], [0, 0, 1, 0], [], []>} : vector<16x128xf32>, vector<128x128xf32>, vector<16x128xf32> -> vector<16x128xf32>
    %116 = vector.extract_strided_slice %12 {offsets = [0, 0], sizes = [1, 128], strides = [1, 1]} : vector<3x128xf32> to vector<1x128xf32>
    %117 = vector.broadcast %116 : vector<1x128xf32> to vector<16x128xf32>
    %118 = arith.mulf %115, %117 : vector<16x128xf32>
    %cst_33 = arith.constant dense<0.000000e+00> : vector<16xf32>
    %119 = vector.multi_reduction <add>, %118, %cst_33 [1] : vector<16x128xf32> to vector<16xf32>
    %120 = vector.shape_cast %119 : vector<16xf32> to vector<16x1xf32>
    %cst_34 = arith.constant 0.000000e+00 : f32
    %121 = vector.broadcast %cst_34 : f32 to vector<16x1xf32>
    %122 = arith.subf %121, %120 : vector<16x1xf32>
    %123 = vector.extract_strided_slice %3 {offsets = [0, 0], sizes = [16, 1], strides = [1, 1]} : vector<16x3xf32> to vector<16x1xf32>
    %124 = arith.subf %122, %123 : vector<16x1xf32>
    %125 = math.absf %124 : vector<16x1xf32>
    %126 = vector.shape_cast %125 : vector<16x1xf32> to vector<1x16x1xf32>
    %cst_35 = arith.constant dense<0.000000e+00> : vector<1xf32>
    %127 = vector.multi_reduction <add>, %126, %cst_35 [1, 2] : vector<1x16x1xf32> to vector<1xf32>
    %128 = vector.shape_cast %127 : vector<1xf32> to vector<1x1x1xf32>
    %129 = vector.extract %128[0, 0, 0] : f32 from vector<1x1x1xf32>
    %cst_36 = arith.constant 0.000000e+00 : f32
    %130 = arith.addf %cst_36, %129 : f32
    %131 = vector.extract_strided_slice %12 {offsets = [1, 0], sizes = [1, 128], strides = [1, 1]} : vector<3x128xf32> to vector<1x128xf32>
    %132 = vector.broadcast %131 : vector<1x128xf32> to vector<16x128xf32>
    %133 = arith.mulf %115, %132 : vector<16x128xf32>
    %cst_37 = arith.constant dense<0.000000e+00> : vector<16xf32>
    %134 = vector.multi_reduction <add>, %133, %cst_37 [1] : vector<16x128xf32> to vector<16xf32>
    %135 = vector.shape_cast %134 : vector<16xf32> to vector<16x1xf32>
    %cst_38 = arith.constant 0.000000e+00 : f32
    %136 = vector.broadcast %cst_38 : f32 to vector<16x1xf32>
    %137 = arith.subf %136, %135 : vector<16x1xf32>
    %138 = vector.extract_strided_slice %3 {offsets = [0, 1], sizes = [16, 1], strides = [1, 1]} : vector<16x3xf32> to vector<16x1xf32>
    %139 = arith.subf %137, %138 : vector<16x1xf32>
    %140 = math.absf %139 : vector<16x1xf32>
    %141 = vector.shape_cast %140 : vector<16x1xf32> to vector<1x16x1xf32>
    %cst_39 = arith.constant dense<0.000000e+00> : vector<1xf32>
    %142 = vector.multi_reduction <add>, %141, %cst_39 [1, 2] : vector<1x16x1xf32> to vector<1xf32>
    %143 = vector.shape_cast %142 : vector<1xf32> to vector<1x1x1xf32>
    %144 = vector.extract %143[0, 0, 0] : f32 from vector<1x1x1xf32>
    %145 = arith.addf %130, %144 : f32
    %146 = vector.extract_strided_slice %12 {offsets = [2, 0], sizes = [1, 128], strides = [1, 1]} : vector<3x128xf32> to vector<1x128xf32>
    %147 = vector.broadcast %146 : vector<1x128xf32> to vector<16x128xf32>
    %148 = arith.mulf %115, %147 : vector<16x128xf32>
    %cst_40 = arith.constant dense<0.000000e+00> : vector<16xf32>
    %149 = vector.multi_reduction <add>, %148, %cst_40 [1] : vector<16x128xf32> to vector<16xf32>
    %150 = vector.shape_cast %149 : vector<16xf32> to vector<16x1xf32>
    %cst_41 = arith.constant 0.000000e+00 : f32
    %151 = vector.broadcast %cst_41 : f32 to vector<16x1xf32>
    %152 = arith.subf %151, %150 : vector<16x1xf32>
    %153 = vector.extract_strided_slice %3 {offsets = [0, 2], sizes = [16, 1], strides = [1, 1]} : vector<16x3xf32> to vector<16x1xf32>
    %154 = arith.subf %152, %153 : vector<16x1xf32>
    %155 = math.absf %154 : vector<16x1xf32>
    %156 = vector.shape_cast %155 : vector<16x1xf32> to vector<1x16x1xf32>
    %cst_42 = arith.constant dense<0.000000e+00> : vector<1xf32>
    %157 = vector.multi_reduction <add>, %156, %cst_42 [1, 2] : vector<1x16x1xf32> to vector<1xf32>
    %158 = vector.shape_cast %157 : vector<1xf32> to vector<1x1x1xf32>
    %159 = vector.extract %158[0, 0, 0] : f32 from vector<1x1x1xf32>
    %160 = arith.addf %145, %159 : f32
    %cst_43 = arith.constant 4.800000e+01 : f32
    %161 = arith.divf %160, %cst_43 : f32
    %162 = arith.subf %80, %18 : vector<2x1xf32>
    %163 = math.absf %162 : vector<2x1xf32>
    %164 = vector.shape_cast %163 : vector<2x1xf32> to vector<1x2x1xf32>
    %cst_44 = arith.constant dense<0.000000e+00> : vector<1xf32>
    %165 = vector.multi_reduction <add>, %164, %cst_44 [1, 2] : vector<1x2x1xf32> to vector<1xf32>
    %166 = vector.shape_cast %165 : vector<1xf32> to vector<1x1x1xf32>
    %167 = vector.extract %166[0, 0, 0] : f32 from vector<1x1x1xf32>
    %cst_45 = arith.constant 2.000000e+00 : f32
    %168 = arith.divf %167, %cst_45 : f32
    %c0_46 = arith.constant 0 : index
    %169 = memref.load %arg4[%c0_46] : memref<2xf32, #tpu.memory_space<smem>>
    memref.store %168, %arg4[%c0_46] : memref<2xf32, #tpu.memory_space<smem>>
    %c1_47 = arith.constant 1 : index
    %170 = memref.load %arg4[%c1_47] : memref<2xf32, #tpu.memory_space<smem>>
    memref.store %161, %arg4[%c1_47] : memref<2xf32, #tpu.memory_space<smem>>
    return
  }
}

</mosaic_0001>

<bundles_post_ra>
// kernel: equivariant_denoise_pred_losses.1
= control target key start
LH: loop header
LB: loop body
LE: loop exit
PB: predicated region body
PF: predicated region fallthrough
CT: control target
= control target key end

     0   :  { %v1398_v2 = vmov 1   ;;  %v1399_v3 = vmov 0   ;;  %s1822_s0 = inlined_call_operand.vmem [shape: f32[16,128], index: 0, kind: input, shape index: {}]   ;;  %s1823_s1 = inlined_call_operand.vmem [shape: f32[16,8], index: 1, kind: input, shape index: {}]   ;;  %s1824_s2 = inlined_call_operand.vmem [shape: f32[3,128,128], index: 2, kind: input, shape index: {}]   ;;  %s1825_s3 = inlined_call_operand.vmem [shape: f32[10,128], index: 3, kind: input, shape index: {}]   ;;  %s1826_s4 = inlined_call_operand.vmem [shape: f32[2], index: 4, kind: output, shape index: {}]  }
   0x1   :  { %v1437_v0 = vld [vmem:[%s1823_s1] sm:$0xff]  ;;  %1367 = vset.pattern.permute.xlu1 %v1398_v2  ;;  %1366 = vset.pattern.permute.xlu0 %v1399_v3  ;;  %v23_v4 = vld [vmem:[%s1824_s2 + $0x8] sm:$0xff]  ;;  %v24_v5 = vld [vmem:[%s1824_s2 + $0x10] sm:$0xff] }
   0x2   :  { %v22_v1 = vld [vmem:[%s1824_s2] sm:$0xff]  ;;  %v25_v6 = vld [vmem:[%s1824_s2 + $0x18] sm:$0xff]  ;;  %93 = vperm.xlu1 %1367, %v1437_v0   ;;  %76 = vperm.xlu0 %1366, %v1437_v0   ;;  %v1459_v8 = vld [vmem:[%s1823_s1 + $0x8] sm:$0xff] }
   0x3   :  { %v1454_v7 = vpack.c.bf16 %v23_v4, %v22_v1  ;;  %v1461_v9 = vpack.c.bf16 %v25_v6, %v24_v5  ;;  %v26_v10 = vld [vmem:[%s1824_s2 + $0x20] sm:$0xff]  ;;  %v27_v11 = vld [vmem:[%s1824_s2 + $0x28] sm:$0xff] }
   0x5   :  { %1172 = vmatprep.subr.bf16.mxu0 %v1454_v7 }
   0x6   :  { %1174 = vmatpush3.bf16.msra.mxu0 %v1454_v7  ;;  %97 = vperm.xlu1 %1367, %v1459_v8  }
   0x7   :  { %81 = vperm.xlu0 %1366, %v1459_v8  }
   0x8   :  { %9 = vsyncpa [#allocation3], 0  ;;  %1176 = vmatprep.subr.bf16.mxu0 %v1461_v9  ;;  %v28_v12 = vld [vmem:[%s1824_s2 + $0x30] sm:$0xff]  ;;  %v29_v13 = vld [vmem:[%s1824_s2 + $0x38] sm:$0xff]  ;;  %v1480_v14 = vpack.c.bf16 %v27_v11, %v26_v10  ;;  %v1400_v15 = vmov 2   ;;  %v84_v29 = vlaneseq  ;;  %vm296_vm0 = vcmp.eq.f32.partialorder %v1437_v0, 0.0 }
   0x9   :  { %v1483_v16 = vpack.c.bf16 %v29_v13, %v28_v12  ;;  %v30_v17 = vld [vmem:[%s1824_s2 + $0x40] sm:$0xff]  ;;  %v31_v18 = vld [vmem:[%s1824_s2 + $0x48] sm:$0xff]  ;;  %v32_v20 = vld [vmem:[%s1824_s2 + $0x50] sm:$0xff]  ;;  %vm317_vm1 = vcmp.eq.f32.partialorder %v1437_v0, 1.0  ;;  %vm297_vm2 = vcmp.eq.f32.partialorder %v1459_v8, 0.0  ;;  %vm318_vm3 = vcmp.eq.f32.partialorder %v1459_v8, 1.0 }
   0xa   :  { %1178 = vmatpush3.bf16.msra.mxu0 %v1461_v9  ;;  %1369 = vset.pattern.permute.xlu1 %v1400_v15  ;;  %v1496_v19 = vpack.c.bf16 %v31_v18, %v30_v17  ;;  %v33_v21 = vld [vmem:[%s1824_s2 + $0x58] sm:$0xff]  ;;  %v34_v23 = vld [vmem:[%s1824_s2 + $0x60] sm:$0xff]  ;;  %v35_v24 = vld [vmem:[%s1824_s2 + $0x68] sm:$0xff]  ;;  %v1531_v30 = vshrl.u32 %v84_v29, 7  ;;  %v1401_v29 = vmov 6   ;;  %vm1403_vm4 = vmmov 0  }
   0xb   :  { %1368 = vset.pattern.permute.xlu0 %v1400_v15  ;;  %113 = vperm.xlu1 %1369, %v1459_v8   ;;  %v1506_v22 = vpack.c.bf16 %v33_v21, %v32_v20  ;;  %v1516_v25 = vpack.c.bf16 %v35_v24, %v34_v23  ;;  %v36_v26 = vld [vmem:[%s1824_s2 + $0x70] sm:$0xff]  ;;  %v37_v27 = vld [vmem:[%s1824_s2 + $0x78] sm:$0xff]  ;;  %v1537_v32 = vld [vmem:[%s1825_s3] sm:$0xff]  ;;  %vm338_vm9 = vcmask 1040384   ;;  %vm426_vm10 = vcmask 1041408   ;;  %s1406_s10 = smov 124  }
   0xc   :  { %109 = vperm.xlu0 %1368, %v1437_v0   ;;  %1180 = vmatprep.subr.bf16.mxu0 %v1480_v14  ;;  %v1526_v28 = vpack.c.bf16 %v37_v27, %v36_v26  ;;  %v86_v31 = vsub.s32 0, %v1531_v30  ;;  %v102_v33 = vsub.s32 1, %v1531_v30  ;;  %v118_v39 = vsub.s32 2, %v1531_v30  ;;  %v18_v40 = vld [vmem:[%s1822_s0] sm:$0xff]  ;;  %v19_v43 = vld [vmem:[%s1822_s0 + $0x8] sm:$0xff]  ;;  %v822_v61 = vld [vmem:[%s1824_s2 + $0x90] sm:$0xff] }
   0xd   :  { %v820_v58 = vld [vmem:[%s1824_s2 + $0x80] sm:$0xff]  ;;  %v821_v59 = vld [vmem:[%s1824_s2 + $0x88] sm:$0xff]  ;;  %v823_v62 = vld [vmem:[%s1824_s2 + $0x98] sm:$0xff]  ;;  %s1407_s11 = smov 123   ;;  %vm702_vm11 = vcmask 7168   ;;  %vm787_vm12 = vcmask 1024  }
   0xe   :  { %1182 = vmatpush3.bf16.msra.mxu0 %v1480_v14  ;;  %v1543_v34 = vrot.slane %v1537_v32, %v86_v31  ;;  %v1548_v37 = vrot.slane %v1537_v32, %v102_v33  ;;  %v1561_v47 = vrot.slane %v1537_v32, %v118_v39  ;;  %v1572_v60 = vpack.c.bf16 %v821_v59, %v820_v58  ;;  %v824_v1 = vld [vmem:[%s1824_s2 + $0xa0] sm:$0xff]  ;;  %v825_v2 = vld [vmem:[%s1824_s2 + $0xa8] sm:$0xff]  ;;  %v826_v5 = vld [vmem:[%s1824_s2 + $0xb0] sm:$0xff]  ;;  %s811_s19 = sshll.u32 %s1826_s4, 4  ;;  %s812_s19 = int_to_ptr.vmem [resolvable:$true] %s811_s19 }
   0xf   :  { %1184 = vmatprep.subr.bf16.mxu0 %v1483_v16  ;;  %v1582_v63 = vpack.c.bf16 %v823_v62, %v822_v61  ;;  %v1592_v4 = vpack.c.bf16 %v825_v2, %v824_v1  ;;  %v827_v6 = vld [vmem:[%s1824_s2 + $0xb8] sm:$0xff]  ;;  %v828_v11 = vld [vmem:[%s1824_s2 + $0xc0] sm:$0xff]  ;;  %v829_v12 = vld [vmem:[%s1824_s2 + $0xc8] sm:$0xff]  ;;  %1370 = vset.pattern.permute.xlu1 %v1401_v29  ;;  %s1384_s24 = scalar_lea.vmem %s812_s19, 16  ;;  %p1389_p1 = scmp.lt.s32.totalorder %s812_s19, %s812_s19 }
  0x10   :  { %1204 = vmatprep.subr.bf16.mxu1 %v1572_v60  ;;  %v1602_v10 = vpack.c.bf16 %v827_v6, %v826_v5  ;;  %v1612_v13 = vpack.c.bf16 %v829_v12, %v828_v11  ;;  %v830_v15 = vld [vmem:[%s1824_s2 + $0xd0] sm:$0xff]  ;;  %v831_v17 = vld [vmem:[%s1824_s2 + $0xd8] sm:$0xff]  ;;  %v832_v20 = vld [vmem:[%s1824_s2 + $0xe0] sm:$0xff]  ;;  %1371 = vset.pattern.permute.xlu0 %v1401_v29  ;;  %p1385_p0 = scmp.ne.s32.totalorder %s812_s19, %s1384_s24  ;;  %p1390_p2 = scmp.lt.s32.totalorder %s1384_s24, %s1384_s24 }
  0x11   :  { %1206 = vmatpush3.bf16.msra.mxu1 %v1572_v60  ;;  %v1622_v18 = vpack.c.bf16 %v831_v17, %v830_v15  ;;  %v833_v21 = vld [vmem:[%s1824_s2 + $0xe8] sm:$0xff]  ;;  %v834_v24 = vld [vmem:[%s1824_s2 + $0xf0] sm:$0xff]  ;;  %v835_v26 = vld [vmem:[%s1824_s2 + $0xf8] sm:$0xff] }
  0x12   :  { %1186 = vmatpush3.bf16.msra.mxu0 %v1483_v16  ;;  %1208 = vmatprep.subr.bf16.mxu1 %v1582_v63  ;;  %v1630_v23 = vpack.c.bf16 %v833_v21, %v832_v20  ;;  %v1641_v27 = vpack.c.bf16 %v835_v26, %v834_v24  ;;  %v837_v39 = vld [vmem:[%s1824_s2 + $0x108] sm:$0xff]  ;;  %v842_v29 = vld [vmem:[%s1824_s2 + $0x130] sm:$0xff]  ;;  %p1391_p3 = por %p1390_p2, %p1389_p1 }
  0x13   :  { %1188 = vmatprep.subr.bf16.mxu0 %v1496_v19 }
  0x14   :  { %p1392_p4 = pnand %p1391_p3, %p1385_p0 }
  0x15   :  { %1210 = vmatpush3.bf16.msra.mxu1 %v1582_v63 }
  0x16   :  { %1190 = vmatpush3.bf16.msra.mxu0 %v1496_v19  ;;  %1212 = vmatprep.subr.bf16.mxu1 %v1592_v4 }
  0x17   :  { %1192 = vmatprep.subr.bf16.mxu0 %v1506_v22 }
  0x19   :  { %1214 = vmatpush3.bf16.msra.mxu1 %v1592_v4 }
  0x1a   :  { %1194 = vmatpush3.bf16.msra.mxu0 %v1506_v22  ;;  %1216 = vmatprep.subr.bf16.mxu1 %v1602_v10 }
  0x1b   :  { %1196 = vmatprep.subr.bf16.mxu0 %v1516_v25 }
  0x1d   :  { %1218 = vmatpush3.bf16.msra.mxu1 %v1602_v10 }
  0x1e   :  { %1198 = vmatpush3.bf16.msra.mxu0 %v1516_v25  ;;  %1220 = vmatprep.subr.bf16.mxu1 %v1612_v13 }
  0x1f   :  { %1200 = vmatprep.subr.bf16.mxu0 %v1526_v28 }
  0x21   :  { %1222 = vmatpush3.bf16.msra.mxu1 %v1612_v13 }
  0x22   :  { %1202 = vmatpush3.bf16.msra.mxu0 %v1526_v28  ;;  %1224 = vmatprep.subr.bf16.mxu1 %v1622_v18 }
  0x25   :  { %1226 = vmatpush3.bf16.msra.mxu1 %v1622_v18 }
  0x26   :  { %1228 = vmatprep.subr.bf16.mxu1 %v1630_v23 }
  0x29   :  { %1230 = vmatpush3.bf16.msra.mxu1 %v1630_v23 }
  0x2a   :  { %1232 = vmatprep.subr.bf16.mxu1 %v1641_v27 }
  0x2d   :  { %1234 = vmatpush3.bf16.msra.mxu1 %v1641_v27 }
  0x81   :  { %v94_v35 = vpop.permute.xlu1 %93  ;;  %v77_v36 = vpop.permute.xlu0 %76 }
  0x82   :  { %v88_v38 = vmul.f32 %v1543_v34, %v77_v36  ;;  %v104_v45 = vmul.f32 %v1548_v37, %v94_v35  ;;  %v298_v35 = vsel %vm296_vm0, 1, %v1399_v3  ;;  %v299_v36 = vsel %vm297_vm2, 1, %v1399_v3 }
  0x83   :  { %301 = vperm.xlu1 %1370, %v298_v35   ;;  %304 = vperm.xlu0 %1371, %v299_v36   ;;  %v843_v35 = vld [vmem:[%s1824_s2 + $0x138] sm:$0xff] }
  0x84   :  { %v90_v46 = vadd.f32 %v88_v38, %v18_v40  ;;  %v836_v38 = vld [vmem:[%s1824_s2 + $0x100] sm:$0xff]  ;;  %v319_v40 = vsel %vm317_vm1, 1, %v1399_v3  ;;  %v1245_v36 = vpack.c.bf16 %v843_v35, %v842_v29 }
  0x85   :  { %v98_v41 = vpop.permute.xlu1 %97 }
  0x86   :  { %v82_v42 = vpop.permute.xlu0 %81  ;;  %v105_v48 = vmul.f32 %v1548_v37, %v98_v41  ;;  %v106_v55 = vadd.f32 %v104_v45, %v90_v46  ;;  %v1402_v41 = vmov 0.0|0.0   ;;  %v320_v45 = vsel %vm318_vm3, 1, %v1399_v3 }
  0x87   :  { %v89_v44 = vmul.f32 %v1543_v34, %v82_v42  ;;  %1235 = vmatprep.subr.bf16.mxu0 %v1402_v41  ;;  %v1236_v42 = vpack.c.bf16 %v837_v39, %v836_v38  ;;  %1259 = vmatprep.subr.bf16.mxu1 %v1402_v41  ;;  %v844_v38 = vld [vmem:[%s1824_s2 + $0x140] sm:$0xff]  ;;  %v845_v39 = vld [vmem:[%s1824_s2 + $0x148] sm:$0xff] }
  0x88   :  { %322 = vperm.xlu1 %1370, %v319_v40   ;;  %v1248_v40 = vpack.c.bf16 %v845_v39, %v844_v38 }
  0x89   :  { %v91_v49 = vadd.f32 %v89_v44, %v19_v43  ;;  %v838_v43 = vld [vmem:[%s1824_s2 + $0x110] sm:$0xff]  ;;  %v839_v44 = vld [vmem:[%s1824_s2 + $0x118] sm:$0xff] }
  0x8a   :  { %v114_v50 = vpop.permute.xlu1 %113  ;;  %v1239_v46 = vpack.c.bf16 %v839_v44, %v838_v43  ;;  %v847_v43 = vld [vmem:[%s1824_s2 + $0x158] sm:$0xff] }
  0x8b   :  { %v107_v51 = vadd.f32 %v105_v48, %v91_v49  ;;  %v110_v52 = vpop.permute.xlu0 %109  ;;  %v121_v53 = vmul.f32 %v1561_v47, %v114_v50  ;;  %v840_v48 = vld [vmem:[%s1824_s2 + $0x120] sm:$0xff]  ;;  %v841_v49 = vld [vmem:[%s1824_s2 + $0x128] sm:$0xff] }
  0x8c   :  { %v120_v54 = vmul.f32 %v1561_v47, %v110_v52  ;;  %325 = vperm.xlu1 %1370, %v320_v45   ;;  %v1242_v50 = vpack.c.bf16 %v841_v49, %v840_v48  ;;  %v848_v45 = vld [vmem:[%s1824_s2 + $0x160] sm:$0xff]  ;;  %v850_v49 = vld [vmem:[%s1824_s2 + $0x170] sm:$0xff] }
  0x8d   :  { %v123_v56 = vadd.f32 %v121_v53, %v107_v51  ;;  %v126_v51 = vsub.s32 3, %v1531_v30 }
  0x8e   :  { %v122_v57 = vadd.f32 %v120_v54, %v106_v55 }
  0x8f   :  { %v127_v3 = vrot.slane %v1537_v32, %v126_v51 }
  0x90   :  { %993 = vmatprep.mubr.f32.mxu0 %v122_v57 }
  0x91   :  { %994 = vmatmul.mubr.f32.vlgmr.msra.gmra.mrb[0].mxu0 %v123_v56 }
  0x92   :  { %1237 = vmatpush3.bf16.msra.mxu0 %v1236_v42 }
  0x93   :  { %1238 = vmatprep.subr.bf16.mxu0 %v1402_v41 }
  0x96   :  { %1240 = vmatpush3.bf16.msra.mxu0 %v1239_v46 }
  0x97   :  { %1241 = vmatprep.subr.bf16.mxu0 %v1402_v41 }
  0x9a   :  { %1243 = vmatpush3.bf16.msra.mxu0 %v1242_v50 }
  0x9b   :  { %1244 = vmatprep.subr.bf16.mxu0 %v1402_v41 }
  0x9e   :  { %1246 = vmatpush3.bf16.msra.mxu0 %v1245_v36 }
  0x9f   :  { %1247 = vmatprep.subr.bf16.mxu0 %v1402_v41 }
  0xa2   :  { %1249 = vmatpush3.bf16.msra.mxu0 %v1248_v40 }
  0xa3   :  { %1250 = vmatprep.subr.bf16.mxu0 %v1402_v41 }
 0x164   :  { %v995_v52 = vpop.f32.mrb[0].mxu0 }
 0x165   :  { %v200_v53 = vadd.f32 %v995_v52, %v127_v3  ;;  %v194_v54 = vpop.f32.mrb[1].mxu0  ;;  %v1726_v52 = vpop.permute.xlu1 %301 }
 0x166   :  { %v195_v55 = vadd.f32 %v194_v54, %v127_v3  ;;  %v1404_v3 = vmov 0.0   ;;  %v219_v54 = vsub.s32 4, %v1531_v30  ;;  %vm306_vm7 = vcmp.eq.s32.totalorder %v1726_v52, 1 }
 0x167   :  { %v853_v56 = vmul.f32 -1.442695, %v200_v53  ;;  %1063 = vmatprep.mubr.msk.f32.mxu0 %vm1403_vm4, %v1404_v3 }
 0x168   :  { %v852_v57 = vmul.f32 -1.442695, %v195_v55 }
 0x169   :  { %1372 = vpow2.f32 %v853_v56  ;;  %v1732_v56 = vpop.permute.xlu0 %304 }
 0x16a   :  { %1374 = vpow2.f32 %v852_v57  ;;  %vm307_vm5 = vcmp.eq.s32.totalorder %v1732_v56, 1 }
 0x173   :  { %v1373_v58 = vpop.eup %1372 }
 0x174   :  { %v1375_v59 = vpop.eup %1374  ;;  %v210_v61 = vadd.f32 1.0, %v1373_v58 }
 0x175   :  { %v209_v62 = vadd.f32 1.0, %v1375_v59 }
 0x176   :  { %1376 = vrcp.f32 %v210_v61 }
 0x177   :  { %1378 = vrcp.f32 %v209_v62 }
 0x180   :  { %v1377_v1 = vpop.eup %1376 }
 0x181   :  { %v1379_v2 = vpop.eup %1378  ;;  %v598_v5 = vsub.f32 1.0, %v1377_v1  ;;  %v216_v12 = vmul.f32 %v1377_v1, %v200_v53 }
 0x182   :  { %v215_v6 = vmul.f32 %v1379_v2, %v195_v55  ;;  %v597_v11 = vsub.f32 1.0, %v1379_v2 }
 0x183   :  { %v600_v15 = vmul.f32 %v598_v5, %v200_v53  ;;  %v1728_v53 = vpop.permute.xlu1 %322 }
 0x184   :  { %1028 = vmatprep.mubr.f32.mxu1 %v215_v6  ;;  %v599_v17 = vmul.f32 %v597_v11, %v195_v55  ;;  %v220_v55 = vrot.slane %v1537_v32, %v219_v54  ;;  %vm327_vm8 = vcmp.eq.s32.totalorder %v1728_v53, 1 }
 0x185   :  { %1029 = vmatmul.mubr.f32.vlgmr.msra.gmra.mrb[0].mxu1 %v216_v12  ;;  %v602_v20 = vadd.f32 1.0, %v600_v15 }
 0x186   :  { %1261 = vmatpush3.bf16.xpose.msra.mxu1 %v1236_v42  ;;  %v601_v21 = vadd.f32 1.0, %v599_v17  ;;  %v846_v42 = vld [vmem:[%s1824_s2 + $0x150] sm:$0xff]  ;;  %1098 = vmatprep.mubr.msk.f32.mxu1 %vm1403_vm4, %v1404_v3 }
 0x187   :  { %1262 = vmatprep.subr.bf16.mxu1 %v1402_v41  ;;  %v1680_v24 = vmul.f32 %v1377_v1, %v602_v20  ;;  %v1251_v44 = vpack.c.bf16 %v847_v43, %v846_v42  ;;  %v1734_v57 = vpop.permute.xlu1 %325 }
 0x188   :  { %v1682_v26 = vmul.f32 %v1379_v2, %v601_v21  ;;  %vm328_vm6 = vcmp.eq.s32.totalorder %v1734_v57, 1 }
 0x189   :  { %1252 = vmatpush3.bf16.msra.mxu0 %v1251_v44 }
 0x18a   :  { %1253 = vmatprep.subr.bf16.mxu0 %v1402_v41 }
 0x18e   :  { %1264 = vmatpush3.bf16.xpose.msra.mxu1 %v1239_v46  ;;  %v849_v46 = vld [vmem:[%s1824_s2 + $0x168] sm:$0xff] }
 0x18f   :  { %1265 = vmatprep.subr.bf16.mxu1 %v1402_v41  ;;  %v1254_v48 = vpack.c.bf16 %v849_v46, %v848_v45 }
 0x191   :  { %1255 = vmatpush3.bf16.msra.mxu0 %v1254_v48 }
 0x192   :  { %1256 = vmatprep.subr.bf16.mxu0 %v1402_v41 }
 0x196   :  { %1267 = vmatpush3.bf16.xpose.msra.mxu1 %v1242_v50  ;;  %v851_v50 = vld [vmem:[%s1824_s2 + $0x178] sm:$0xff]  ;;  %s1405_s2 = smov 125  }
 0x197   :  { %1268 = vmatprep.subr.bf16.mxu1 %v1402_v41  ;;  %v1257_v51 = vpack.c.bf16 %v851_v50, %v850_v49 }
 0x199   :  { %1258 = vmatpush3.bf16.msra.mxu0 %v1257_v51 }
 0x19a   :  { %1284 = vmatprep.subr.bf16.mxu0 %v1572_v60 }
 0x19e   :  { %1270 = vmatpush3.bf16.xpose.msra.mxu1 %v1245_v36 }
 0x19f   :  { %1271 = vmatprep.subr.bf16.mxu1 %v1402_v41 }
 0x1a6   :  { %1273 = vmatpush3.bf16.xpose.msra.mxu1 %v1248_v40 }
 0x1a7   :  { %1274 = vmatprep.subr.bf16.mxu1 %v1402_v41 }
 0x1ae   :  { %1276 = vmatpush3.bf16.xpose.msra.mxu1 %v1251_v44 }
 0x1af   :  { %1277 = vmatprep.subr.bf16.mxu1 %v1402_v41 }
 0x1b6   :  { %1279 = vmatpush3.bf16.xpose.msra.mxu1 %v1254_v48 }
 0x1b7   :  { %1280 = vmatprep.subr.bf16.mxu1 %v1402_v41 }
 0x1be   :  { %1282 = vmatpush3.bf16.xpose.msra.mxu1 %v1257_v51 }
 0x1bf   :  { %1316 = vmatprep.subr.bf16.mxu1 %v1454_v7 }
 0x258   :  { %v1030_v58 = vpop.f32.mrb[0].mxu1 }
 0x259   :  { %v293_v59 = vadd.f32 %v1030_v58, %v220_v55  ;;  %v287_v41 = vpop.f32.mrb[1].mxu1 }
 0x25a   :  { %v288_v61 = vadd.f32 %v287_v41, %v220_v55 }
 0x25b   :  { %v330_v62 = vsel %vm328_vm6, %v293_v59, 0.0  ;;  %v309_v1 = vsel %vm307_vm5, %v293_v59, 0.0 }
 0x25c   :  { %v308_v2 = vsel %vm306_vm7, %v288_v61, 0.0  ;;  %v329_v5 = vsel %vm327_vm8, %v288_v61, 0.0 }
 0x25d   :  { %v310_v6 = vadd.f32 %v309_v1, %v308_v2  ;;  %v331_v11 = vadd.f32 %v330_v62, %v329_v5 }
 0x25f   :  { %v311_v12 = vrot.slane %v310_v6, 4  ;;  %v332_v15 = vrot.slane %v331_v11, 4 }
 0x261   :  { %v312_v17 = vadd.f32 %v311_v12, %v310_v6  ;;  %v333_v20 = vadd.f32 %v332_v15, %v331_v11 }
 0x263   :  { %v313_v21 = vrot.slane %v312_v17, 2  ;;  %v334_v29 = vrot.slane %v333_v20, 2 }
 0x265   :  { %v314_v35 = vadd.f32 %v313_v21, %v312_v17  ;;  %v335_v36 = vadd.f32 %v334_v29, %v333_v20 }
 0x267   :  { %v315_v38 = vrot.slane %v314_v35, 1  ;;  %v336_v39 = vrot.slane %v335_v36, 1 }
 0x269   :  { %v316_v40 = vadd.f32 %v315_v38, %v314_v35  ;;  %v337_v42 = vadd.f32 %v336_v39, %v335_v36 }
 0x26b   :  { %v339_v43 = vsel %vm338_vm9, %v316_v40, %v337_v42 }
 0x26c   :  { %1064 = vmatmul.mubr.f32.vlgmr.msra.gmra.mrb[2].mxu0 %v339_v43 }
 0x26d   :  { %1286 = vmatpush3.bf16.xpose.msra.mxu0 %v1572_v60  ;;  %v342_v60 = vsub.s32 5, %v1531_v30 }
 0x26e   :  { %1288 = vmatprep.subr.bf16.mxu0 %v1582_v63 }
 0x275   :  { %1290 = vmatpush3.bf16.xpose.msra.mxu0 %v1582_v63  ;;  %v343_v63 = vrot.slane %v1537_v32, %v342_v60 }
 0x276   :  { %1292 = vmatprep.subr.bf16.mxu0 %v1592_v4 }
 0x27d   :  { %1294 = vmatpush3.bf16.xpose.msra.mxu0 %v1592_v4 }
 0x27e   :  { %1296 = vmatprep.subr.bf16.mxu0 %v1602_v10 }
 0x285   :  { %1298 = vmatpush3.bf16.xpose.msra.mxu0 %v1602_v10 }
 0x286   :  { %1300 = vmatprep.subr.bf16.mxu0 %v1612_v13 }
 0x28d   :  { %1302 = vmatpush3.bf16.xpose.msra.mxu0 %v1612_v13 }
 0x28e   :  { %1304 = vmatprep.subr.bf16.mxu0 %v1622_v18 }
 0x295   :  { %1306 = vmatpush3.bf16.xpose.msra.mxu0 %v1622_v18  ;;  %v423_v18 = vsub.s32 6, %v1531_v30 }
 0x296   :  { %1308 = vmatprep.subr.bf16.mxu0 %v1630_v23 }
 0x29d   :  { %1310 = vmatpush3.bf16.xpose.msra.mxu0 %v1630_v23  ;;  %v424_v23 = vrot.slane %v1537_v32, %v423_v18 }
 0x29e   :  { %1312 = vmatprep.subr.bf16.mxu0 %v1641_v27 }
 0x2a5   :  { %1314 = vmatpush3.bf16.xpose.msra.mxu0 %v1641_v27 }
 0x33f   :  { %v410_v4 = vpop.f32.mrb[2].mxu0 }
 0x340   :  { %v411_v10 = vadd.f32 %v410_v4, %v343_v63  ;;  %v1065_v44 = vpop.f32.mrb[3].mxu0 }
 0x342   :  { %v854_v13 = vmul.f32 -1.442695, %v411_v10 }
 0x344   :  { %1380 = vpow2.f32 %v854_v13 }
 0x34e   :  { %v1381_v45 = vpop.eup %1380 }
 0x34f   :  { %v417_v46 = vadd.f32 1.0, %v1381_v45 }
 0x351   :  { %1382 = vrcp.f32 %v417_v46 }
 0x35b   :  { %v1383_v48 = vpop.eup %1382 }
 0x35c   :  { %v435_v49 = vsub.f32 1.0, %v1383_v48  ;;  %v420_v50 = vmul.f32 %v1383_v48, %v411_v10 }
 0x35e   :  { %v436_v27 = vmul.f32 %v435_v49, %v411_v10  ;;  %v425_v51 = vmul.f32 %v424_v23, %v420_v50  ;;  %v432_v10 = vsub.s32 7, %v1531_v30 }
 0x360   :  { %v437_v3 = vadd.f32 1.0, %v436_v27  ;;  %v433_v44 = vrot.slane %v1537_v32, %v432_v10 }
 0x362   :  { %v438_v54 = vmul.f32 %v1383_v48, %v437_v3 }
 0x364   :  { %v439_v55 = vmul.f32 %v438_v54, %v424_v23 }
 0x366   :  { %1099 = vmatmul.mubr.f32.vlgmr.msra.gmra.mrb[2].mxu1 %v439_v55 }
 0x367   :  { %1318 = vmatpush3.bf16.xpose.msra.mxu1 %v1454_v7 }
 0x368   :  { %1320 = vmatprep.subr.bf16.mxu1 %v1461_v9 }
 0x36f   :  { %1322 = vmatpush3.bf16.xpose.msra.mxu1 %v1461_v9 }
 0x370   :  { %1324 = vmatprep.subr.bf16.mxu1 %v1480_v14 }
 0x377   :  { %1326 = vmatpush3.bf16.xpose.msra.mxu1 %v1480_v14 }
 0x378   :  { %1328 = vmatprep.subr.bf16.mxu1 %v1483_v16 }
 0x37f   :  { %1330 = vmatpush3.bf16.xpose.msra.mxu1 %v1483_v16 }
 0x380   :  { %1332 = vmatprep.subr.bf16.mxu1 %v1496_v19 }
 0x387   :  { %1334 = vmatpush3.bf16.xpose.msra.mxu1 %v1496_v19 }
 0x388   :  { %1336 = vmatprep.subr.bf16.mxu1 %v1506_v22 }
 0x38f   :  { %1338 = vmatpush3.bf16.xpose.msra.mxu1 %v1506_v22 }
 0x390   :  { %1340 = vmatprep.subr.bf16.mxu1 %v1516_v25 }
 0x397   :  { %1342 = vmatpush3.bf16.xpose.msra.mxu1 %v1516_v25 }
 0x398   :  { %1344 = vmatprep.subr.bf16.mxu1 %v1526_v28 }
 0x39f   :  { %1346 = vmatpush3.bf16.xpose.msra.mxu1 %v1526_v28 }
 0x439   :  { %v506_v7 = vpop.f32.mrb[2].mxu1 }
 0x43a   :  { %v513_v9 = vrot.slane %v506_v7, %v86_v31  ;;  %v519_v14 = vrot.slane %v506_v7, %v102_v33  ;;  %v1100_v16 = vpop.f32.mrb[3].mxu1 }
 0x43c   :  { %v514_v19 = vsel %vm306_vm7, %v513_v9, 0.0  ;;  %v515_v22 = vsel %vm307_vm5, %v513_v9, 0.0 }
 0x43d   :  { %v520_v25 = vsel %vm327_vm8, %v519_v14, %v514_v19  ;;  %v521_v28 = vsel %vm328_vm6, %v519_v14, %v515_v22 }
 0x43e   :  { %1133 = vmatprep.mubr.f32.mxu0 %v520_v25 }
 0x43f   :  { %1134 = vmatmul.mubr.f32.vlgmr.msra.gmra.mrb[4].mxu0 %v521_v28 }
 0x512   :  { %v1135_v58 = vpop.f32.mrb[4].mxu0 }
 0x513   :  { %v606_v31 = vmul.f32 %v1135_v58, %v1680_v24  ;;  %v588_v59 = vpop.f32.mrb[5].mxu0 }
 0x514   :  { %v605_v33 = vmul.f32 %v1682_v26, %v588_v59  ;;  %v427_v26 = vsel %vm426_vm10, %v425_v51, 0.0 }
 0x516   :  { %1168 = vmatprep.mubr.f32.mxu1 %v605_v33 }
 0x517   :  { %1169 = vmatmul.mubr.f32.vlgmr.msra.gmra.mrb[4].mxu1 %v606_v31 }
 0x5ea   :  { %v1170_v52 = vpop.f32.mrb[4].mxu1 }
 0x5eb   :  { %v673_v41 = vpop.f32.mrb[5].mxu1  ;;  %v717_v56 = vmul.f32 %v1170_v52, %v1548_v37  ;;  %v683_v53 = vmul.f32 %v1170_v52, %v1543_v34  ;;  %v750_v62 = vmul.f32 %v1170_v52, %v1561_v47 }
 0x5ec   :  { %v749_v57 = vmul.f32 %v673_v41, %v1561_v47  ;;  %v682_v61 = vmul.f32 %v673_v41, %v1543_v34  ;;  %v716_v24 = vmul.f32 %v673_v41, %v1548_v37 }
 0x5ed   :  { %720 = vadd.xlane.f32.xlu0 %v717_v56  ;;  %686 = vadd.xlane.f32.xlu1 %v683_v53 }
 0x5f1   :  { %751 = vadd.xlane.f32.xlu1 %v749_v57  ;;  %684 = vadd.xlane.f32.xlu0 %v682_v61 }
 0x5f5   :  { %428 = vadd.xlane.f32.xlu1 %v427_v26  ;;  %718 = vadd.xlane.f32.xlu0 %v716_v24 }
 0x5f9   :  { %753 = vadd.xlane.f32.xlu0 %v750_v62 }
 0x67a   :  { %v721_v1 = vpop.xlane.xlu0 %720  ;;  %v687_v2 = vpop.xlane.xlu1 %686 }
 0x67b   :  { %v723_v5 = vsub.f32 0.0, %v721_v1  ;;  %v689_v6 = vsub.f32 0.0, %v687_v2 }
 0x67d   :  { %v725_v11 = vsub.f32 %v723_v5, %v1459_v8  ;;  %v691_v12 = vsub.f32 %v689_v6, %v1459_v8 }
 0x67e   :  { %v685_v34 = vpop.xlane.xlu0 %684  ;;  %v752_v21 = vpop.xlane.xlu1 %751 }
 0x67f   :  { %v727_v15 = vand.u32 2147483647, %v725_v11  ;;  %v693_v17 = vand.u32 2147483647, %v691_v12  ;;  %v688_v20 = vsub.f32 0.0, %v685_v34  ;;  %v755_v29 = vsub.f32 0.0, %v752_v21 }
 0x681   :  { %v690_v37 = vsub.f32 %v688_v20, %v1437_v0  ;;  %698 = vrot.lane.b32.xlu1 %v693_v17, %s1405_s2  ;;  %732 = vrot.lane.b32.xlu0 %v727_v15, %s1406_s10  ;;  %v757_v40 = vsub.f32 %v755_v29, %v1437_v0 }
 0x682   :  { %v719_v47 = vpop.xlane.xlu0 %718  ;;  %v429_v13 = vpop.xlane.xlu1 %428 }
 0x683   :  { %v692_v35 = vand.u32 2147483647, %v690_v37  ;;  %v722_v36 = vsub.f32 0.0, %v719_v47  ;;  %v759_v63 = vand.u32 2147483647, %v757_v40  ;;  %v434_v45 = vadd.f32 %v433_v44, %v429_v13 }
 0x685   :  { %v724_v38 = vsub.f32 %v722_v36, %v1437_v0  ;;  %696 = vrot.lane.b32.xlu0 %v692_v35, %s1405_s2  ;;  %v73_v0 = vld [vmem:[%s1825_s3 + $0x8] sm:$0x3] }
 0x686   :  { %v754_v39 = vpop.xlane.xlu0 %753 }
 0x687   :  { %v726_v42 = vand.u32 2147483647, %v724_v38  ;;  %v756_v43 = vsub.f32 0.0, %v754_v39 }
 0x689   :  { %v758_v60 = vsub.f32 %v756_v43, %v1459_v8  ;;  %730 = vrot.lane.b32.xlu1 %v726_v42, %s1406_s10  ;;  %v785_v8 = vsub.f32 %v434_v45, %v73_v0 }
 0x68b   :  { %v760_v4 = vand.u32 2147483647, %v758_v60  ;;  %v786_v27 = vand.u32 2147483647, %v785_v8 }
 0x68d   :  { %763 = vrot.lane.b32.xlu1 %v759_v63, %s1407_s11  ;;  %765 = vrot.lane.b32.xlu0 %v760_v4, %s1407_s11  ;;  %v788_v54 = vsel %vm787_vm12, %v786_v27, 0.0 }
 0x6f3   :  { %v733_v46 = vpop.permute.xlu0 %732  ;;  %v699_v18 = vpop.permute.xlu1 %698 }
 0x6f4   :  { %v704_v48 = vsel %vm702_vm11, %v699_v18, 0.0  ;;  %v737_v32 = vsel %vm702_vm11, %v733_v46, 0.0 }
 0x6f7   :  { %v697_v23 = vpop.permute.xlu0 %696 }
 0x6f8   :  { %v703_v49 = vsel %vm702_vm11, %v697_v23, 0.0 }
 0x6f9   :  { %v705_v50 = vadd.f32 %v704_v48, %v703_v49 }
 0x6fb   :  { %v731_v30 = vpop.permute.xlu1 %730  ;;  %706 = vadd.xlane.f32.xlu1 %v705_v50 }
 0x6fc   :  { %v736_v51 = vsel %vm702_vm11, %v731_v30, 0.0 }
 0x6fd   :  { %v738_v3 = vadd.f32 %v737_v32, %v736_v51 }
 0x6ff   :  { %v764_v55 = vpop.permute.xlu1 %763  ;;  %739 = vadd.xlane.f32.xlu0 %v738_v3  ;;  %789 = vadd.xlane.f32.xlu1 %v788_v54  ;;  %v766_v7 = vpop.permute.xlu0 %765 }
 0x700   :  { %v769_v9 = vsel %vm702_vm11, %v764_v55, 0.0  ;;  %v770_v14 = vsel %vm702_vm11, %v766_v7, 0.0 }
 0x701   :  { %v771_v16 = vadd.f32 %v770_v14, %v769_v9 }
 0x703   :  { %772 = vadd.xlane.f32.xlu0 %v771_v16 }
 0x788   :  { %v707_v19 = vpop.xlane.xlu1 %706 }
 0x789   :  { %v708_v22 = vrot.slane %v707_v19, 4 }
 0x78b   :  { %v709_v25 = vadd.f32 %v708_v22, %v707_v19 }
 0x78c   :  { %v790_v28 = vpop.xlane.xlu1 %789  ;;  %v740_v58 = vpop.xlane.xlu0 %739 }
 0x78d   :  { %v710_v31 = vrot.slane %v709_v25, 2  ;;  %v791_v59 = vrot.slane %v790_v28, 4  ;;  %v741_v33 = vrot.slane %v740_v58, 4 }
 0x78f   :  { %v792_v52 = vadd.f32 %v791_v59, %v790_v28  ;;  %v742_v41 = vadd.f32 %v741_v33, %v740_v58  ;;  %v711_v56 = vadd.f32 %v710_v31, %v709_v25 }
 0x790   :  { %v773_v53 = vpop.xlane.xlu0 %772 }
 0x791   :  { %v793_v57 = vrot.slane %v792_v52, 2  ;;  %v743_v61 = vrot.slane %v742_v41, 2  ;;  %v774_v24 = vrot.slane %v773_v53, 4  ;;  %v712_v26 = vrot.slane %v711_v56, 1 }
 0x793   :  { %v775_v62 = vadd.f32 %v774_v24, %v773_v53  ;;  %v713_v1 = vadd.f32 %v712_v26, %v711_v56  ;;  %v744_v2 = vadd.f32 %v743_v61, %v742_v41  ;;  %v794_v5 = vadd.f32 %v793_v57, %v792_v52 }
 0x795   :  { %v776_v6 = vrot.slane %v775_v62, 2  ;;  %1347 = vpush %v713_v1  ;;  %v745_v11 = vrot.slane %v744_v2, 1  ;;  %v795_v15 = vrot.slane %v794_v5, 1 }
 0x797   :  { %v777_v12 = vadd.f32 %v776_v6, %v775_v62  ;;  %v746_v34 = vadd.f32 %v745_v11, %v744_v2  ;;  %v796_v21 = vadd.f32 %v795_v15, %v794_v5 }
 0x799   :  { %1349 = vpush %v746_v34  ;;  %v778_v17 = vrot.slane %v777_v12, 1 }
 0x79b   :  { %v779_v20 = vadd.f32 %v778_v17, %v777_v12 }
 0x79d   :  { %1351 = vpush %v779_v20 }
 0x79e   :  { %1353 = vpush %v796_v21 }
 0x7c6   :  { %s1348_s3 = spop %1347 }
 0x7ca   :  { %s1350_s14 = spop %1349 }
 0x7cb   :  { %s748_s15 = sadd.f32 %s1350_s14, %s1348_s3 }
 0x7ce   :  { %s1352_s16 = spop %1351 }
 0x7cf   :  { %s781_s20 = sadd.f32 %s1352_s16, %s748_s15  ;;  %s1354_s21 = spop %1353 }
 0x7d0   :  { %s800_s22 = smul.f32 0.5, %s1354_s21 }
 0x7d1   :  { %s784_s23 = smul.f32 0.020833334, %s781_s20 }
 0x7d2   :  { %802 = sst [smem:[#allocation2]] %s800_s22 }
 0x7d3   :  { %804 = sst [smem:[#allocation2 + $0x1]] %s784_s23 }
 0x7d4   :  { %1395 = shalt.err (!%p1392_p4)
}
 0x7d5   :  { %s1408_s25 = smov [#allocation2]  }
 0x7d6   :  { %814 = dma.smem_to_vmem %s1408_s25, 16, %s812_s19, [#allocation3]  }
 0x7d7   :  { %1396 = dma.done.wait [#allocation3], 16  }
 0x7d8   :  { %1397 = vsyncadd [#allocation3], 4294967280 }
 0x7d9   :  { %818 = sfence }
 0x7da   :  { %819 = vsyncpa [#allocation3], 1 }

</bundles_post_ra>
